<compile_context>
chip_gen: v7x
topology: tpu7x:2x2x1
jax: 0.10.0
libtpu: 0.0.40
codegen_flags: <defaults>
</compile_context>

<pallas_src>
import functools

import jax
import jax.numpy as jnp
from jax import lax
from jax.experimental import pallas as pl
from jax.experimental.pallas import tpu as pltpu


# ----------------------------------------------------------------------------- helpers
def _activate(y, neg_slope):
    if neg_slope == 0.0:
        return jnp.maximum(y, 0.0)
    return jnp.where(y > 0, y, neg_slope * y)


def _lane_partial_sums(y, s_tile):
    """Lane-partial sum / sum-of-squares of a (Cout, s_tile) f32 tile.

    Static 128-lane-group slices + plain VPU adds; the single cross-lane (XLU) reduction
    is deferred to the finalize step."""
    part_s = y[:, 0:128]
    part_q = part_s * part_s
    for g in range(1, s_tile // 128):
        yg = y[:, g * 128:(g + 1) * 128]
        part_s = part_s + yg
        part_q = part_q + yg * yg
    return part_s, part_q


# ----------------------------------------------------------------------------- kernels
def _fused_conv_norm_act_kernel(p_ref, w_ref, o_ref, acc_sum, acc_sq,
                                *, S, s_tile, num_s, eps, neg_slope):
    """i_norm=True, single pass.

    p_ref   : (1, K*Cin, s_tile) im2col patches tile (compute dtype)
    w_ref   : (Cout, K*Cin)      fused depthwise*pointwise weights (compute dtype)
    o_ref   : (1, Cout, S_pad)   output block, VMEM-resident across the spatial grid axis;
                                 doubles as the un-normalized conv buffer.
    acc_sum/acc_sq : (Cout, 128) f32 lane-partial statistics accumulators
    """
    s_idx = pl.program_id(1)

    @pl.when(s_idx == 0)
    def _init():
        acc_sum[...] = jnp.zeros_like(acc_sum)
        acc_sq[...] = jnp.zeros_like(acc_sq)

    # fused depthwise+pointwise conv tile: (Cout, K*Cin) @ (K*Cin, s_tile) on the MXU
    y = jnp.dot(w_ref[...], p_ref[0], preferred_element_type=jnp.float32)

    start = pl.multiple_of(s_idx * s_tile, s_tile)
    o_ref[0, :, pl.ds(start, s_tile)] = y

    # padded spatial columns of `patches` are zero => y there is exactly zero (no mask).
    part_s, part_q = _lane_partial_sums(y, s_tile)
    acc_sum[...] += part_s
    acc_sq[...] += part_q

    @pl.when(s_idx == num_s - 1)
    def _finalize():
        inv_s = 1.0 / S
        mean = jnp.sum(acc_sum[...], axis=-1, keepdims=True) * inv_s      # (Cout, 1)
        ex2 = jnp.sum(acc_sq[...], axis=-1, keepdims=True) * inv_s
        # one-pass variance; clamp guards f32 cancellation when |mean| >> std
        var = jnp.maximum(ex2 - mean * mean, 0.0)
        rstd = lax.rsqrt(var + eps)

        def _norm_tile(g, carry):
            off = pl.multiple_of(g * s_tile, s_tile)
            yt = o_ref[0, :, pl.ds(off, s_tile)]
            o_ref[0, :, pl.ds(off, s_tile)] = _activate((yt - mean) * rstd, neg_slope)
            return carry

        lax.fori_loop(0, num_s, _norm_tile, 0, unroll=False)


def _conv_stats_kernel(p_ref, w_ref, y_ref, mean_ref, rstd_ref, acc_sum, acc_sq,
                       *, S, s_tile, eps):
    """i_norm=True fallback, pass 1: conv tile (bf16 intermediate) + running statistics."""
    s_idx = pl.program_id(1)

    @pl.when(s_idx == 0)
    def _init():
        acc_sum[...] = jnp.zeros_like(acc_sum)
        acc_sq[...] = jnp.zeros_like(acc_sq)

    y = jnp.dot(w_ref[...], p_ref[0], preferred_element_type=jnp.float32)
    y_ref[0] = y.astype(y_ref.dtype)

    part_s, part_q = _lane_partial_sums(y, s_tile)
    acc_sum[...] += part_s
    acc_sq[...] += part_q

    @pl.when(s_idx == pl.num_programs(1) - 1)
    def _finalize():
        inv_s = 1.0 / S
        mean = jnp.sum(acc_sum[...], axis=-1, keepdims=True) * inv_s
        ex2 = jnp.sum(acc_sq[...], axis=-1, keepdims=True) * inv_s
        var = jnp.maximum(ex2 - mean * mean, 0.0)
        mean_ref[0] = mean
        rstd_ref[0] = lax.rsqrt(var + eps)


def _norm_act_kernel(y_ref, mean_ref, rstd_ref, o_ref, *, neg_slope):
    """i_norm=True fallback, pass 2: InstanceNorm + activation on the bf16 intermediate."""
    y = y_ref[0].astype(jnp.float32)
    o_ref[0] = _activate((y - mean_ref[0]) * rstd_ref[0], neg_slope).astype(o_ref.dtype)


def _conv_bias_act_kernel(p_ref, w_ref, b_ref, o_ref, *, neg_slope):
    """i_norm=False: fused conv + folded effective bias + activation (single pass)."""
    y = jnp.dot(w_ref[...], p_ref[0], preferred_element_type=jnp.float32)
    o_ref[0] = _activate(y + b_ref[...], neg_slope).astype(o_ref.dtype)


# ----------------------------------------------------------------------------- wrapper
def _round_up(x, m):
    return (x + m - 1) // m * m


def _vmem_capacity_bytes():
    try:
        return int(pltpu.get_tpu_info().vmem_capacity_bytes)
    except Exception:
        return 64 << 20          # conservative default (v7x per-core VMEM)


def down_block_dws(x, w_dw, b_dw, w_pw, b_pw, *, kernel_size=4, stride=2,
                   activation="relu", i_norm=True, eps=1e-5,
                   compute_dtype=jnp.bfloat16, s_tile=None, norm_mode="auto"):
    """x: (N, Cin, H, W) float32.  Returns (N, Cout, Ho, Wo) float32.

    norm_mode (i_norm=True only): "auto" (VMEM-gated), "fused", or "two_pass".
    """
    N, Cin, H, W = x.shape
    Cout = w_pw.shape[0]
    KH = KW = kernel_size
    K = KH * KW
    KCin = K * Cin

    # reflect padding = 1 (matches nn.Conv2d(padding=1, padding_mode='reflect'))
    xp = jnp.pad(x, ((0, 0), (0, 0), (1, 1), (1, 1)), mode="reflect")
    Hp, Wp = H + 2, W + 2
    Ho = (Hp - KH) // stride + 1
    Wo = (Wp - KW) // stride + 1
    S = Ho * Wo

    cbytes = jnp.dtype(compute_dtype).itemsize
    vmem_cap = _vmem_capacity_bytes()

    # ---- spatial tiling: lane-dense (multiple of 128), double-buffering accounted -----
    if s_tile is None:
        y_stream = 2 if i_norm else 4                 # bf16 intermediate / f32 out stream
        bytes_per_col = 2 * KCin * cbytes + 2 * Cout * y_stream
        lane_cap = 4096 if vmem_cap >= (96 << 20) else 2048
        s_tile = max(128, min(lane_cap, ((8 << 20) // max(bytes_per_col, 1)) // 128 * 128))
    s_tile = min(s_tile, _round_up(S, 128))
    S_pad = _round_up(S, s_tile)
    num_s = S_pad // s_tile

    # ---- im2col: patches[n, k*Cin+ci, oh*Wo+ow] = xp[n, ci, stride*oh+kh, stride*ow+kw]
    # Streamed in the (half-width) compute dtype.
    # TODO(synk): move im2col in-kernel (strided DMA tap assembly from the reflect-padded
    # image) to remove the remaining K/stride^2 = 4x inflated HBM copy of the input.
    taps = []
    for kh in range(KH):
        for kw in range(KW):
            taps.append(xp[:, :,
                           kh:kh + stride * (Ho - 1) + 1:stride,
                           kw:kw + stride * (Wo - 1) + 1:stride])
    patches = jnp.stack(taps, axis=1).reshape(N, KCin, S).astype(compute_dtype)
    patches = jnp.pad(patches, ((0, 0), (0, 0), (0, S_pad - S)))

    # ---- fused weights: W_eff[co, k*Cin+ci] = w_pw[co, ci] * w_dw[ci, k] ---------------
    wdw = w_dw.reshape(Cin, K).T                      # (K, Cin)
    wpw = w_pw.reshape(Cout, Cin)                     # (Cout, Cin)
    w_eff = (wpw[:, None, :] * wdw[None, :, :]).reshape(Cout, KCin).astype(compute_dtype)

    neg_slope = 0.0 if activation == "relu" else 0.2

    def _cp(sem, need):
        limit = int(min(max(need, 32 << 20), vmem_cap - (8 << 20)))
        return pltpu.CompilerParams(dimension_semantics=sem, vmem_limit_bytes=limit)

    def _finish(out3):
        if S_pad == S:                                # fast path: no extra output copy
            return out3.reshape(N, Cout, Ho, Wo)
        return out3[:, :, :S].reshape(N, Cout, Ho, Wo)

    stream_bytes = 2 * KCin * s_tile * cbytes + 2 * Cout * KCin * cbytes

    if not i_norm:
        # No InstanceNorm: fold both conv biases into one effective bias.
        b_eff = (wpw @ b_dw.reshape(Cin, 1) + b_pw.reshape(Cout, 1)).astype(jnp.float32)
        need = stream_bytes + 2 * Cout * s_tile * 4 + (4 << 20)
        out = pl.pallas_call(
            functools.partial(_conv_bias_act_kernel, neg_slope=neg_slope),
            out_shape=jax.ShapeDtypeStruct((N, Cout, S_pad), jnp.float32),
            grid_spec=pltpu.PrefetchScalarGridSpec(
                num_scalar_prefetch=0,
                grid=(N, num_s),
                in_specs=[
                    pl.BlockSpec((1, KCin, s_tile), lambda n, s: (n, 0, s)),
                    pl.BlockSpec((Cout, KCin), lambda n, s: (0, 0)),
                    pl.BlockSpec((Cout, 1), lambda n, s: (0, 0)),
                ],
                out_specs=pl.BlockSpec((1, Cout, s_tile), lambda n, s: (n, 0, s)),
            ),
            compiler_params=_cp(("parallel", "parallel"), need),
        )(patches, w_eff, b_eff)
        return _finish(out)

    # ---- i_norm=True: biases cancel under affine-free InstanceNorm (biased variance) ---
    # Resident-output fusion budget is generation-aware: ~48 MiB on 128-MiB-VMEM v5e/v6e,
    # ~24 MiB on v7x's 64-MiB VMEM.
    resident_budget = min(48 << 20, vmem_cap // 2 - (8 << 20))
    resident_bytes = 2 * Cout * S_pad * 4            # output block (allow double-buffer over N)
    use_fused = (norm_mode == "fused" or
                 (norm_mode == "auto" and resident_bytes + stream_bytes <= resident_budget))

    if use_fused:
        # Single pass: conv -> VMEM-resident y (the output block) -> stats -> norm+act.
        need = resident_bytes + stream_bytes + 2 * Cout * 128 * 4 + (4 << 20)
        out = pl.pallas_call(
            functools.partial(_fused_conv_norm_act_kernel, S=S, s_tile=s_tile,
                              num_s=num_s, eps=eps, neg_slope=neg_slope),
            out_shape=jax.ShapeDtypeStruct((N, Cout, S_pad), jnp.float32),
            grid_spec=pltpu.PrefetchScalarGridSpec(
                num_scalar_prefetch=0,
                grid=(N, num_s),
                in_specs=[
                    pl.BlockSpec((1, KCin, s_tile), lambda n, s: (n, 0, s)),
                    pl.BlockSpec((Cout, KCin), lambda n, s: (0, 0)),
                ],
                out_specs=pl.BlockSpec((1, Cout, S_pad), lambda n, s: (n, 0, 0)),
                scratch_shapes=[pltpu.VMEM((Cout, 128), jnp.float32),
                                pltpu.VMEM((Cout, 128), jnp.float32)],
            ),
            compiler_params=_cp(("parallel", "arbitrary"), need),
        )(patches, w_eff)
        return _finish(out)

    # ---- fallback: two passes with a bf16 intermediate (half the round-trip stream) ----
    # TODO(synk): for v7x with N==1, emit per-tile partial stats instead of cross-step
    # scratch so the spatial grid axis can be megacore-parallel.
    need1 = stream_bytes + 2 * Cout * s_tile * 2 + 2 * Cout * 128 * 4 + (4 << 20)
    y, mean, rstd = pl.pallas_call(
        functools.partial(_conv_stats_kernel, S=S, s_tile=s_tile, eps=eps),
        out_shape=(jax.ShapeDtypeStruct((N, Cout, S_pad), jnp.bfloat16),
                   jax.ShapeDtypeStruct((N, Cout, 1), jnp.float32),
                   jax.ShapeDtypeStruct((N, Cout, 1), jnp.float32)),
        grid_spec=pltpu.PrefetchScalarGridSpec(
            num_scalar_prefetch=0,
            grid=(N, num_s),
            in_specs=[
                pl.BlockSpec((1, KCin, s_tile), lambda n, s: (n, 0, s)),
                pl.BlockSpec((Cout, KCin), lambda n, s: (0, 0)),
            ],
            out_specs=(
                pl.BlockSpec((1, Cout, s_tile), lambda n, s: (n, 0, s)),
                pl.BlockSpec((1, Cout, 1), lambda n, s: (n, 0, 0)),
                pl.BlockSpec((1, Cout, 1), lambda n, s: (n, 0, 0)),
            ),
            scratch_shapes=[pltpu.VMEM((Cout, 128), jnp.float32),
                            pltpu.VMEM((Cout, 128), jnp.float32)],
        ),
        compiler_params=_cp(("parallel", "arbitrary"), need1),
    )(patches, w_eff)

    need2 = 2 * Cout * s_tile * (2 + 4) + (4 << 20)
    out = pl.pallas_call(
        functools.partial(_norm_act_kernel, neg_slope=neg_slope),
        out_shape=jax.ShapeDtypeStruct((N, Cout, S_pad), jnp.float32),
        grid_spec=pltpu.PrefetchScalarGridSpec(
            num_scalar_prefetch=0,
            grid=(N, num_s),
            in_specs=[
                pl.BlockSpec((1, Cout, s_tile), lambda n, s: (n, 0, s)),
                pl.BlockSpec((1, Cout, 1), lambda n, s: (n, 0, 0)),
                pl.BlockSpec((1, Cout, 1), lambda n, s: (n, 0, 0)),
            ],
            out_specs=pl.BlockSpec((1, Cout, s_tile), lambda n, s: (n, 0, s)),
        ),
        compiler_params=_cp(("parallel", "parallel"), need2),
    )(y, mean, rstd)
    return _finish(out)


# ----------------------------------------------------------------------------- reference
def _reference(x, w_dw, b_dw, w_pw, b_pw, activation="relu", i_norm=True, eps=1e-5):
    """Plain-JAX reference matching the PyTorch module (for verification)."""
    Cin = x.shape[1]
    xp = jnp.pad(x, ((0, 0), (0, 0), (1, 1), (1, 1)), mode="reflect")
    y = lax.conv_general_dilated(xp, w_dw, window_strides=(2, 2), padding="VALID",
                                 dimension_numbers=("NCHW", "OIHW", "NCHW"),
                                 feature_group_count=Cin,
                                 precision=lax.Precision.HIGHEST)
    y = y + b_dw.reshape(1, -1, 1, 1)
    y = lax.conv_general_dilated(y, w_pw, window_strides=(1, 1), padding="VALID",
                                 dimension_numbers=("NCHW", "OIHW", "NCHW"),
                                 precision=lax.Precision.HIGHEST)
    y = y + b_pw.reshape(1, -1, 1, 1)
    if i_norm:
        mean = y.mean(axis=(2, 3), keepdims=True)
        var = ((y - mean) ** 2).mean(axis=(2, 3), keepdims=True)
        y = (y - mean) / jnp.sqrt(var + eps)
    if activation == "relu":
        return jnp.maximum(y, 0.0)
    return jnp.where(y > 0, y, 0.2 * y)


if __name__ == "__main__":
    key = jax.random.PRNGKey(0)
    N, Cin, H, W = 2, 4, 16, 16
    Cout, KS = 64, 4

    k1, k2, k3, k4, k5 = jax.random.split(key, 5)
    x = jax.random.normal(k1, (N, Cin, H, W), jnp.float32)
    # deterministic synthetic parameters (shapes from nn.Conv2d in __init__)
    w_dw = jax.random.normal(k2, (Cin, 1, KS, KS), jnp.float32) * 0.2   # depthwise, groups=Cin
    b_dw = jax.random.normal(k3, (Cin,), jnp.float32) * 0.1
    w_pw = jax.random.normal(k4, (Cout, Cin, 1, 1), jnp.float32) * 0.3  # pointwise 1x1
    b_pw = jax.random.normal(k5, (Cout,), jnp.float32) * 0.1

    # 1) i_norm=True / ReLU : fully fused single-pass path (VMEM-resident y)
    out = down_block_dws(x, w_dw, b_dw, w_pw, b_pw,
                         kernel_size=KS, stride=2, activation="relu", i_norm=True)
    out = jax.block_until_ready(out)
    ref = _reference(x, w_dw, b_dw, w_pw, b_pw, activation="relu", i_norm=True)
    assert out.shape == (N, Cout, 8, 8), out.shape
    err1 = float(jnp.max(jnp.abs(out - ref)))
    assert jnp.allclose(out, ref, atol=2e-2, rtol=2e-2), err1

    # 2) i_norm=False / LeakyReLU(0.2) : folded-bias single-pass path
    out2 = down_block_dws(x, w_dw, b_dw, w_pw, b_pw,
                          kernel_size=KS, stride=2, activation="leakyrelu", i_norm=False)
    out2 = jax.block_until_ready(out2)
    ref2 = _reference(x, w_dw, b_dw, w_pw, b_pw, activation="leakyrelu", i_norm=False)
    err2 = float(jnp.max(jnp.abs(out2 - ref2)))
    assert jnp.allclose(out2, ref2, atol=2e-2, rtol=2e-2), err2

    # 3) i_norm=True forced two-pass fallback (bf16 intermediate) — exercised for coverage
    out3 = down_block_dws(x, w_dw, b_dw, w_pw, b_pw,
                          kernel_size=KS, stride=2, activation="relu", i_norm=True,
                          norm_mode="two_pass")
    out3 = jax.block_until_ready(out3)
    err3 = float(jnp.max(jnp.abs(out3 - ref)))
    assert jnp.allclose(out3, ref, atol=2e-2, rtol=2e-2), err3

    print("KERNEL_OK")
</pallas_src>

<mosaic_0001>
module attributes {stable_mosaic.version = 11 : i64} {
  func.func @_fused_conv_norm_act_kernel(%arg0: i32, %arg1: i32, %arg2: memref<1x64x128xbf16, #tpu.memory_space<vmem>>, %arg3: memref<64x64xbf16, #tpu.memory_space<vmem>>, %arg4: memref<1x64x128xf32, #tpu.memory_space<vmem>>, %arg5: memref<64x128xf32, #tpu.memory_space<vmem>>, %arg6: memref<64x128xf32, #tpu.memory_space<vmem>>) attributes {dimension_semantics = [#tpu.dimension_semantics<parallel>, #tpu.dimension_semantics<arbitrary>], iteration_bounds = array<i64: 2, 1>, scalar_prefetch = 0 : i64, scratch_operands = 2 : i64, tpu.core_type = #tpu.core_type<tc>, window_params = [{transform_indices = @transform_0, window_bounds = array<i64: 1, 64, 128>}, {pipeline_mode = #tpu.pipeline_mode<synchronous>, transform_indices = @transform_1, window_bounds = array<i64: 64, 64>}, {transform_indices = @transform_2, window_bounds = array<i64: 1, 64, 128>}]} {
    %c0_i32 = arith.constant 0 : i32
    %0 = arith.cmpi eq, %arg1, %c0_i32 : i32
    %1 = arith.extui %0 : i1 to i32
    %c0_i32_0 = arith.constant 0 : i32
    %2 = arith.cmpi ne, %1, %c0_i32_0 : i32
    scf.if %2 {
      %cst_17 = arith.constant 0.000000e+00 : f32
      %23 = vector.broadcast %cst_17 : f32 to vector<64x128xf32>
      %c0_18 = arith.constant 0 : index
      %c0_19 = arith.constant 0 : index
      %24 = vector.load %arg5[%c0_18, %c0_19] : memref<64x128xf32, #tpu.memory_space<vmem>>, vector<64x128xf32>
      tpu.vector_store %arg5[%c0_18, %c0_19], %23 {strides = array<i32>} : memref<64x128xf32, #tpu.memory_space<vmem>>, vector<64x128xf32>,
      %cst_20 = arith.constant 0.000000e+00 : f32
      %25 = vector.broadcast %cst_20 : f32 to vector<64x128xf32>
      %c0_21 = arith.constant 0 : index
      %c0_22 = arith.constant 0 : index
      %26 = vector.load %arg6[%c0_21, %c0_22] : memref<64x128xf32, #tpu.memory_space<vmem>>, vector<64x128xf32>
      tpu.vector_store %arg6[%c0_21, %c0_22], %25 {strides = array<i32>} : memref<64x128xf32, #tpu.memory_space<vmem>>, vector<64x128xf32>,
    } else {
    }
    %c0 = arith.constant 0 : index
    %c0_1 = arith.constant 0 : index
    %3 = vector.load %arg3[%c0, %c0_1] : memref<64x64xbf16, #tpu.memory_space<vmem>>, vector<64x64xbf16>
    %c0_2 = arith.constant 0 : index
    %c0_3 = arith.constant 0 : index
    %c0_4 = arith.constant 0 : index
    %4 = vector.load %arg2[%c0_2, %c0_3, %c0_4] : memref<1x64x128xbf16, #tpu.memory_space<vmem>>, vector<1x64x128xbf16>
    %5 = vector.shape_cast %4 : vector<1x64x128xbf16> to vector<64x128xbf16>
    %cst = arith.constant dense<0.000000e+00> : vector<64x128xf32>
    %6 = tpu.matmul %3, %5, %cst {dimension_numbers = #tpu.dot_dimension_numbers<[1], [0], [0], [1], [0, 0, 1, 1], [], []>} : vector<64x64xbf16>, vector<64x128xbf16>, vector<64x128xf32> -> vector<64x128xf32>
    %c128_i32 = arith.constant 128 : i32
    %7 = arith.muli %arg1, %c128_i32 : i32
    %8 = tpu.assume_multiple %7, 128 : i32
    %c0_5 = arith.constant 0 : index
    %c0_6 = arith.constant 0 : index
    %9 = arith.index_cast %8 : i32 to index
    %10 = vector.load %arg4[%c0_5, %c0_6, %9] : memref<1x64x128xf32, #tpu.memory_space<vmem>>, vector<1x64x128xf32>
    %11 = vector.shape_cast %10 : vector<1x64x128xf32> to vector<64x128xf32>
    %12 = vector.shape_cast %6 : vector<64x128xf32> to vector<1x64x128xf32>
    tpu.vector_store %arg4[%c0_5, %c0_6, %9], %12 {strides = array<i32>} : memref<1x64x128xf32, #tpu.memory_space<vmem>>, vector<1x64x128xf32>,
    %13 = arith.mulf %6, %6 : vector<64x128xf32>
    %c0_7 = arith.constant 0 : index
    %c0_8 = arith.constant 0 : index
    %14 = vector.load %arg5[%c0_7, %c0_8] : memref<64x128xf32, #tpu.memory_space<vmem>>, vector<64x128xf32>
    %15 = arith.addf %14, %6 : vector<64x128xf32>
    %c0_9 = arith.constant 0 : index
    %c0_10 = arith.constant 0 : index
    %16 = vector.load %arg5[%c0_9, %c0_10] : memref<64x128xf32, #tpu.memory_space<vmem>>, vector<64x128xf32>
    tpu.vector_store %arg5[%c0_9, %c0_10], %15 {strides = array<i32>} : memref<64x128xf32, #tpu.memory_space<vmem>>, vector<64x128xf32>,
    %c0_11 = arith.constant 0 : index
    %c0_12 = arith.constant 0 : index
    %17 = vector.load %arg6[%c0_11, %c0_12] : memref<64x128xf32, #tpu.memory_space<vmem>>, vector<64x128xf32>
    %18 = arith.addf %17, %13 : vector<64x128xf32>
    %c0_13 = arith.constant 0 : index
    %c0_14 = arith.constant 0 : index
    %19 = vector.load %arg6[%c0_13, %c0_14] : memref<64x128xf32, #tpu.memory_space<vmem>>, vector<64x128xf32>
    tpu.vector_store %arg6[%c0_13, %c0_14], %18 {strides = array<i32>} : memref<64x128xf32, #tpu.memory_space<vmem>>, vector<64x128xf32>,
    %c0_i32_15 = arith.constant 0 : i32
    %20 = arith.cmpi eq, %arg1, %c0_i32_15 : i32
    %21 = arith.extui %20 : i1 to i32
    %c0_i32_16 = arith.constant 0 : i32
    %22 = arith.cmpi ne, %21, %c0_i32_16 : i32
    scf.if %22 {
      %c0_17 = arith.constant 0 : index
      %c0_18 = arith.constant 0 : index
      %23 = vector.load %arg5[%c0_17, %c0_18] : memref<64x128xf32, #tpu.memory_space<vmem>>, vector<64x128xf32>
      %cst_19 = arith.constant dense<0.000000e+00> : vector<64xf32>
      %24 = vector.multi_reduction <add>, %23, %cst_19 [1] : vector<64x128xf32> to vector<64xf32>
      %25 = vector.shape_cast %24 : vector<64xf32> to vector<64x1xf32>
      %cst_20 = arith.constant 1.562500e-02 : f32
      %26 = vector.broadcast %cst_20 : f32 to vector<64x1xf32>
      %27 = arith.mulf %25, %26 : vector<64x1xf32>
      %c0_21 = arith.constant 0 : index
      %c0_22 = arith.constant 0 : index
      %28 = vector.load %arg6[%c0_21, %c0_22] : memref<64x128xf32, #tpu.memory_space<vmem>>, vector<64x128xf32>
      %cst_23 = arith.constant dense<0.000000e+00> : vector<64xf32>
      %29 = vector.multi_reduction <add>, %28, %cst_23 [1] : vector<64x128xf32> to vector<64xf32>
      %30 = vector.shape_cast %29 : vector<64xf32> to vector<64x1xf32>
      %cst_24 = arith.constant 1.562500e-02 : f32
      %31 = vector.broadcast %cst_24 : f32 to vector<64x1xf32>
      %32 = arith.mulf %30, %31 : vector<64x1xf32>
      %33 = arith.mulf %27, %27 : vector<64x1xf32>
      %34 = arith.subf %32, %33 : vector<64x1xf32>
      %cst_25 = arith.constant 0.000000e+00 : f32
      %35 = vector.broadcast %cst_25 : f32 to vector<64x1xf32>
      %36 = arith.maximumf %34, %35 : vector<64x1xf32>
      %cst_26 = arith.constant 9.99999974E-6 : f32
      %37 = vector.broadcast %cst_26 : f32 to vector<64x1xf32>
      %38 = arith.addf %36, %37 : vector<64x1xf32>
      %39 = math.rsqrt %38 : vector<64x1xf32>
      %c0_i32_27 = arith.constant 0 : i32
      %c128_i32_28 = arith.constant 128 : i32
      %40 = arith.muli %c0_i32_27, %c128_i32_28 : i32
      %41 = tpu.assume_multiple %40, 128 : i32
      %c0_29 = arith.constant 0 : index
      %c0_30 = arith.constant 0 : index
      %42 = arith.index_cast %41 : i32 to index
      %43 = vector.load %arg4[%c0_29, %c0_30, %42] : memref<1x64x128xf32, #tpu.memory_space<vmem>>, vector<1x64x128xf32>
      %44 = vector.shape_cast %43 : vector<1x64x128xf32> to vector<64x128xf32>
      %45 = vector.broadcast %27 : vector<64x1xf32> to vector<64x128xf32>
      %46 = arith.subf %44, %45 : vector<64x128xf32>
      %47 = vector.broadcast %39 : vector<64x1xf32> to vector<64x128xf32>
      %48 = arith.mulf %46, %47 : vector<64x128xf32>
      %cst_31 = arith.constant 0.000000e+00 : f32
      %49 = vector.broadcast %cst_31 : f32 to vector<64x128xf32>
      %50 = arith.maximumf %48, %49 : vector<64x128xf32>
      %c0_32 = arith.constant 0 : index
      %c0_33 = arith.constant 0 : index
      %51 = arith.index_cast %41 : i32 to index
      %52 = vector.load %arg4[%c0_32, %c0_33, %51] : memref<1x64x128xf32, #tpu.memory_space<vmem>>, vector<1x64x128xf32>
      %53 = vector.shape_cast %52 : vector<1x64x128xf32> to vector<64x128xf32>
      %54 = vector.shape_cast %50 : vector<64x128xf32> to vector<1x64x128xf32>
      tpu.vector_store %arg4[%c0_32, %c0_33, %51], %54 {strides = array<i32>} : memref<1x64x128xf32, #tpu.memory_space<vmem>>, vector<1x64x128xf32>,
      %c1_i32 = arith.constant 1 : i32
    } else {
    }
    return
  }
  func.func @transform_0(%arg0: i32, %arg1: i32) -> (i32, i32, i32) {
    %c0_i32 = arith.constant 0 : i32
    %c0_i32_0 = arith.constant 0 : i32
    return %arg0, %c0_i32, %arg1 : i32, i32, i32
  }
  func.func @transform_1(%arg0: i32, %arg1: i32) -> (i32, i32) {
    %c0_i32 = arith.constant 0 : i32
    %c0_i32_0 = arith.constant 0 : i32
    %c0_i32_1 = arith.constant 0 : i32
    return %c0_i32, %c0_i32_0 : i32, i32
  }
  func.func @transform_2(%arg0: i32, %arg1: i32) -> (i32, i32, i32) {
    %c0_i32 = arith.constant 0 : i32
    %c0_i32_0 = arith.constant 0 : i32
    %c0_i32_1 = arith.constant 0 : i32
    return %arg0, %c0_i32, %c0_i32_0 : i32, i32, i32
  }
}

</mosaic_0001>

<bundles_post_ra>
// kernel: tpu_custom_call.1
= control target key start
LH: loop header
LB: loop body
LE: loop exit
PB: predicated region body
PF: predicated region fallthrough
CT: control target
= control target key end

     0   :  { %7 = vsyncpa [#allocation5], 0  ;;  %s1330_s0 = inlined_call_operand.hbm [shape: bf16[2,64,128], index: 0, kind: input, shape index: {}]   ;;  %s1331_s1 = inlined_call_operand.hbm [shape: bf16[64,64], index: 1, kind: input, shape index: {}]   ;;  %s1332_s2 = inlined_call_operand.hbm [shape: f32[2,64,128], index: 2, kind: output, shape index: {}]  }
   0x1   :  { %9 = vsyncpa [#allocation5 + $0x1], 0 }
   0x2   :  { %10 = vsyncpa [#allocation8], 0 }
   0x3   :  { %11 = vsyncpa [#allocation6], 0 }
   0x4   :  { %13 = vsyncpa [#allocation6 + $0x1], 0  ;;  %s1006_s9 = smov 0   ;;  %s1008_s10 = smov 0  }
   0x5   :  { %s1010_s11 = smov 0   ;;  %s1012_s12 = smov 0  }
   0x6   :  { %s1014_s13 = smov 0   ;;  %s1016_s14 = smov 0  }
   0x7 LB: > { %s674_s15 = sadd.s32 4294967295, %s982_s14   ;;  %s675_s16 = sadd.s32 4294967294, %s982_s14   ;;  %s982_s14 = sphi %s1016_s14, %s19_s14   ;;  %s978_s13 = sphi %s1014_s13, %s1356_s13   ;;  %s974_s12 = sphi %s1012_s12, %s1355_s12   ;;  %s970_s11 = sphi %s1010_s11, %s1354_s11   ;;  %s966_s10 = sphi %s1008_s10, %s1353_s10   ;;  %s962_s9 = sphi %s1006_s9, %s1352_s9  }
   0x8   : > { %p53_p0 = scmp.ne.s32.totalorder %s966_s10, %s962_s9  ;;  %p1040_p1 = scmp.eq.s32.totalorder %s674_s15, 0 }
   0x9   : > { %p1044_p2 = scmp.eq.s32.totalorder %s674_s15, 1  ;;  %p104_p3 = scmp.eq.s32.totalorder %s675_s16, 1 }
   0xa   : > { %s1337_s17 = scalar_select %p1040_p1, 1, 0 }
   0xb   : > { %s1338_s18 = scalar_select %p1044_p2, 1, 0 }
   0xc   : > { %p1050_p4 = por %p1040_p1, %p53_p0  ;;  %p676_p5 = scmp.ge.s32.totalorder %s982_s14, 1 }
   0xd   : > { %p1055_p6 = por %p104_p3, %p53_p0  ;;  %p111_p7 = scmp.lt.s32.totalorder %s982_s14, 3 }
   0xe   : > { %s1339_s19 = scalar_select %p1050_p4, 1, 0 }
   0xf   : > { %s1340_s20 = scalar_select %p1055_p6, 1, 0 }
  0x10   : > { %p1060_p8 = pnand %p676_p5, %p111_p7  ;;  %s984_s22 = smov [#allocation7]  }
  0x11   : > { %s123_s23 = sshll.u32 %s984_s22, 4  ;;  %s31_s25 = sadd.s32 1, %s978_s13  ;;  %s124_s23 = int_to_ptr.vmem [resolvable:$true] %s123_s23 }
  0x12   : > { %s1341_s21 = scalar_select %p1060_p8, 1, 0 }
  0x13   : > { %p745_p9 = pneg %p1060_p8  ;;  %s838_s28 = scalar_lea.hbm %s1331_s1, 512 }
  0x14   : > { %p839_p12 = scmp.ne.s32.totalorder %s1331_s1, %s838_s28  ;;  %p845_p5 = scmp.lt.u32.totalorder %s838_s28, %s1331_s1 }
  0x15   : > { %p1069_p11 = pnand %p745_p9, %p1040_p1 }
  0x17   : > { %p840_p13 = pneg %p1069_p11 }
  0x19   : > { %p841_p0 = pnand %p840_p13, %p839_p12 }
  0x1b   : > { %p842_p3 = pneg %p841_p0 }
  0x1d   : > { %p847_p7 = pnand %p845_p5, %p842_p3 }
  0x1f   : > { %850 = shalt.err (!%p847_p7)
}
  0x20   : > { %s851_s5 = scalar_lea.vmem %s124_s23, 512  ;;  %p859_p1 = scmp.lt.s32.totalorder %s124_s23, %s124_s23 }
  0x21   : > { %p852_p9 = scmp.ne.s32.totalorder %s124_s23, %s851_s5  ;;  %p860_p4 = scmp.lt.s32.totalorder %s851_s5, %s851_s5 }
  0x23   : > { %p854_p10 = pnand %p852_p9, %p840_p13  ;;  %p861_p8 = por %p860_p4, %p859_p1 }
  0x25   : > { %p855_p6 = pneg %p854_p10 }
  0x27   : > { %p862_p2 = pnand %p861_p8, %p855_p6 }
  0x29   : > { %865 = shalt.err (!%p862_p2)
}
  0x2a   : > { %s985_s6 = smov 64   ;;  %s986_s7 = smov 4  }
  0x2b   : > { %748 = dma.hbm_to_vmem [thread:$0]  (!%p1069_p11), %s1331_s1, 512, %s124_s23, [#allocation8], %s985_s6, %s985_s6, %s986_s7  }
  0x2c   : > { %p33_p1 = scmp.ge.s32.totalorder %s31_s25, 2  ;;  %s40_s16 = sadd.s32 1, %s970_s11 }
  0x2d   : > { %p47_p2 = scmp.ne.s32.totalorder %s970_s11, %s966_s10  ;;  %p48_p4 = scmp.eq.s32.totalorder %s982_s14, 0 }
  0x2e   : > { %s1358_s25 = smov (%p33_p1, %s31_s25), 0  ;;  %p1344_p8 = scmp.ne.s32.totalorder %s1338_s18, 0 }
  0x2f   : > { %p1099_p6 = por %p48_p4, %p47_p2  ;;  %s35_s26 = ssub.s32 %s978_s13, %s1358_s25 }
  0x30   : > { %p1105_p10 = por %p1344_p8, %p47_p2  ;;  %p758_p12 = scmp.lt.s32.totalorder %s982_s14, 2 }
  0x31   : > { %p38_p11 = scmp.eq.s32.totalorder %s35_s26, 0  ;;  %s137_s23 = sand.u32 1, %s970_s11  }
  0x32   : > { %s679_s27 = sshll.u32 %s137_s23, 5  ;;  %s703_s29 = sshll.u32 %s978_s13, 9 }
  0x33   : > { %s1114_s28 = scalar_select %p38_p11, %s970_s11, %s40_s16  }
  0x34   : > { %s1120_s4 = scalar_lea.hbm %s1330_s0, %s703_s29  ;;  %s141_s18 = scalar_lea.vmem [#allocation4], %s679_s27 }
  0x35   : > { %s149_s5 = sshll.u32 %s141_s18, 4  ;;  %p1126_p13 = pnand %p758_p12, %p1099_p6  ;;  %s1122_s5 = int_to_ptr.vmem [resolvable:$true] %s149_s5 }
  0x36   : > { %s1130_s15 = scalar_lea.sflag [#allocation5], %s137_s23  ;;  %s866_s16 = scalar_lea.hbm %s1120_s4, 512 }
  0x37   : > { %p867_p0 = scmp.ne.s32.totalorder %s1120_s4, %s866_s16  ;;  %p868_p3 = pneg %p1126_p13 }
  0x38   : > { %s871_s22 = scalar_lea.hbm %s1330_s0, 1024  ;;  %p872_p9 = scmp.lt.u32.totalorder %s1120_s4, %s1330_s0 }
  0x39   : > { %p869_p5 = pnand %p868_p3, %p867_p0  ;;  %p873_p1 = scmp.lt.u32.totalorder %s871_s22, %s866_s16 }
  0x3a   : > { %p875_p4 = scmp.lt.u32.totalorder %s866_s16, %s1120_s4 }
  0x3b   : > { %p870_p7 = pneg %p869_p5  ;;  %p874_p2 = por %p873_p1, %p872_p9 }
  0x3d   : > { %p876_p6 = por %p875_p4, %p874_p2 }
  0x3f   : > { %p877_p8 = pnand %p876_p6, %p870_p7 }
  0x41   : > { %880 = shalt.err (!%p877_p8)
}
  0x42   : > { %s881_s23 = scalar_lea.vmem %s1122_s5, 512  ;;  %s987_s3 = smov [#allocation4]  }
  0x43   : > { %p882_p12 = scmp.ne.s32.totalorder %s1122_s5, %s881_s23  ;;  %s886_s18 = sshll.u32 %s987_s3, 4  ;;  %s887_s18 = int_to_ptr.vmem [resolvable:$false] %s886_s18 }
  0x44   : > { %s888_s26 = scalar_lea.vmem %s887_s18, 1024  ;;  %p889_p5 = scmp.lt.s32.totalorder %s1122_s5, %s887_s18 }
  0x45   : > { %p884_p11 = pnand %p882_p12, %p868_p3  ;;  %p890_p9 = scmp.lt.s32.totalorder %s888_s26, %s881_s23 }
  0x47   : > { %p885_p0 = pneg %p884_p11  ;;  %p891_p1 = por %p890_p9, %p889_p5 }
  0x49   : > { %p892_p2 = pnand %p891_p1, %p885_p0 }
  0x4b   : > { %895 = shalt.err (!%p892_p2)
}
  0x4c   : > { %752 = dma.hbm_to_vmem [thread:$0]  (!%p1126_p13), %s1120_s4, 512, %s1122_s5, %s1130_s15, %s985_s6, %s985_s6, %s986_s7  }
  0x4d   : > { %p1347_p3 = scmp.ne.s32.totalorder %s1341_s21, 0 }
  0x4e   : > { %s1164_s16 = sand.u32 (!%p1347_p3), 1, %s966_s10   ;;  %p1348_p7 = scmp.ne.s32.totalorder (!%p1347_p3), %s1339_s19, 0 }
  0x4f   : > { %161 = sbr.rel (%p1347_p3) target bundleno = 528 (0x210), region = 28  ;;  %s683_s27 = sshll.u32 (!%p1347_p3), %s1164_s16, 5 }
  0x50   : > { %s164_s22 = scalar_lea.sflag (!%p1347_p3), [#allocation5], %s1164_s16  ;;  %s167_s29 = scalar_lea.vmem (!%p1347_p3), [#allocation4], %s683_s27 }
  0x56   : > { %949 = dma.done.wait (%p1348_p7), %s164_s22, 512  }
  0x57   : > { %951 = vsyncadd (%p1348_p7), %s164_s22, 4294966784  ;;  %p1349_p4 = scmp.ne.s32.totalorder %s1337_s17, 0 }
  0x59   : > { %953 = dma.done.wait (%p1349_p4), [#allocation8], 512  }
  0x5a   : > { %955 = vsyncadd (%p1349_p4), [#allocation8], 4294966784  ;;  %v814_v0 = vld [vmem:[%s167_s29] sm:$0xff]   ;;  %v815_v1 = vld [vmem:[%s167_s29 + $0x8] sm:$0xff]   ;;  %vm273_vm0 = vcmask 523264   ;;  %s685_s17 = sshll.u32 %s1164_s16, 6 }
  0x5b   : > { %713 = vmatprep.subr.bf16.mxu0 %v814_v0  ;;  %729 = vmatprep.subr.bf16.mxu1 %v814_v0  ;;  %v816_v2 = vld [vmem:[%s167_s29 + $0x10] sm:$0xff]   ;;  %v818_v3 = vld [vmem:[#allocation7] sm:$0xff]   ;;  %v817_v5 = vld [vmem:[%s167_s29 + $0x18] sm:$0xff]   ;;  %s1252_s19 = scalar_lea.vmem [#allocation9], %s685_s17  ;;  %s704_s21 = sshll.u32 %s974_s12, 10 }
  0x5c   : > { %714 = vmatpush3.bf16.msra.mxu0 %v814_v0  ;;  %733 = vmatpush3.bf16.msra.mxu1 %v814_v0  ;;  %v819_v4 = vld [vmem:[#allocation7 + $0x10] sm:$0xff]   ;;  %v820_v6 = vld [vmem:[#allocation7 + $0x8] sm:$0xff]   ;;  %v821_v7 = vld [vmem:[#allocation7 + $0x18] sm:$0xff]   ;;  %s580_s6 = sshll.u32 %s1252_s19, 4  ;;  %s1277_s5 = scalar_lea.hbm %s1332_s2, %s704_s21  ;;  %s1279_s6 = int_to_ptr.vmem [resolvable:$true] %s580_s6 }
  0x5d   : > { %715 = vmatprep.subr.bf16.mxu0 %v815_v1  ;;  %730 = vmatprep.subr.bf16.mxu1 %v815_v1  ;;  %s567_s12 = scalar_lea.sflag [#allocation6], %s1164_s16  ;;  %s896_s8 = scalar_lea.vmem %s1279_s6, 1024 }
  0x5e   : > { %721 = vmatprep.mubr.msk.bf16.mxu0 %vm273_vm0, %v818_v3  ;;  %725 = vmatprep.mubr.msk.bf16.mxu1 %vm273_vm0, %v819_v4  ;;  %p897_p13 = scmp.ne.s32.totalorder %s1279_s6, %s896_s8  ;;  %s988_s15 = smov [#allocation9]  }
  0x5f   : > { %s900_s30 = sshll.u32 %s988_s15, 4  ;;  %s901_s30 = int_to_ptr.vmem [resolvable:$false] %s900_s30 }
  0x60   : > { %716 = vmatpush3.bf16.msra.mxu0 %v815_v1  ;;  %734 = vmatpush3.bf16.msra.mxu1 %v815_v1  ;;  %p898_p6 = pnand %p897_p13, %p1105_p10  ;;  %s902_s23 = scalar_lea.vmem %s901_s30, 2048 }
  0x61   : > { %717 = vmatprep.subr.bf16.mxu0 %v816_v2  ;;  %731 = vmatprep.subr.bf16.mxu1 %v816_v2  ;;  %p903_p12 = scmp.lt.s32.totalorder %s1279_s6, %s901_s30  ;;  %p904_p11 = scmp.lt.s32.totalorder %s902_s23, %s896_s8 }
  0x62   : > { %p899_p8 = pneg %p898_p6 }
  0x63   : > { %p905_p0 = por %p904_p11, %p903_p12 }
  0x64   : > { %718 = vmatpush3.bf16.msra.mxu0 %v816_v2  ;;  %735 = vmatpush3.bf16.msra.mxu1 %v816_v2 }
  0x65   : > { %719 = vmatprep.subr.bf16.mxu0 %v817_v5  ;;  %732 = vmatprep.subr.bf16.mxu1 %v817_v5  ;;  %p906_p5 = pnand %p905_p0, %p899_p8 }
  0x68   : > { %720 = vmatpush3.bf16.msra.mxu0 %v817_v5  ;;  %736 = vmatpush3.bf16.msra.mxu1 %v817_v5 }
  0x6b   : > { %722 = vmatmul.mubr.msk.bf16.vlgmr.msra.gmra.mrb[0].mxu0 %vm273_vm0, %v820_v6  ;;  %726 = vmatmul.mubr.msk.bf16.vlgmr.msra.gmra.mrb[0].mxu1 %vm273_vm0, %v821_v7 }
 0x13e   : > { %v1180_v8 = vpop.f32.mrb[0].mxu0  ;;  %v1182_v9 = vpop.f32.mrb[0].mxu1 }
 0x13f   : > { %442 = vadd.xlane.f32.xlu0 %v1182_v9  ;;  %v1185_v10 = vpop.f32.mrb[1].mxu1  ;;  %434 = vadd.xlane.f32.xlu1 %v1180_v8  ;;  %v1188_v11 = vpop.f32.mrb[1].mxu0  ;;  %v365_v16 = vmul.f32 %v1180_v8, %v1180_v8  ;;  %v369_v22 = vmul.f32 %v1182_v9, %v1182_v9 }
 0x140   : > { %v1190_v12 = vpop.f32.mrb[2].mxu0  ;;  %v1192_v13 = vpop.f32.mrb[2].mxu1  ;;  %v363_v18 = vmul.f32 %v1188_v11, %v1188_v11  ;;  %v367_v20 = vmul.f32 %v1185_v10, %v1185_v10 }
 0x141   : > { %v1194_v14 = vpop.f32.mrb[3].mxu0  ;;  %v1196_v15 = vpop.f32.mrb[3].mxu1  ;;  %v366_v17 = vmul.f32 %v1190_v12, %v1190_v12  ;;  %v370_v23 = vmul.f32 %v1192_v13, %v1192_v13 }
 0x142   : > { %v364_v19 = vmul.f32 %v1194_v14, %v1194_v14  ;;  %v368_v21 = vmul.f32 %v1196_v15, %v1196_v15 }
 0x143   : > { %430 = vadd.xlane.f32.xlu0 %v1188_v11  ;;  %436 = vadd.xlane.f32.xlu1 %v1190_v12 }
 0x147   : > { %438 = vadd.xlane.f32.xlu0 %v1185_v10  ;;  %444 = vadd.xlane.f32.xlu1 %v1192_v13 }
 0x14b   : > { %466 = vadd.xlane.f32.xlu0 %v365_v16  ;;  %440 = vadd.xlane.f32.xlu1 %v1196_v15 }
 0x14f   : > { %468 = vadd.xlane.f32.xlu1 %v366_v17  ;;  %432 = vadd.xlane.f32.xlu0 %v1194_v14 }
 0x153   : > { %462 = vadd.xlane.f32.xlu0 %v363_v18  ;;  %464 = vadd.xlane.f32.xlu1 %v364_v19 }
 0x157   : > { %470 = vadd.xlane.f32.xlu0 %v367_v20  ;;  %472 = vadd.xlane.f32.xlu1 %v368_v21 }
 0x15b   : > { %474 = vadd.xlane.f32.xlu0 %v369_v22  ;;  %476 = vadd.xlane.f32.xlu1 %v370_v23 }
 0x1cc   : > { %v443_v24 = vpop.xlane.xlu0 %442  ;;  %v435_v25 = vpop.xlane.xlu1 %434 }
 0x1cd   : > { %v448_v30 = vmul.f32 0.015625, %v435_v25  ;;  %v1236_v58 = vmul.f32 0.015625, %v443_v24 }
 0x1cf   : > { %v488_v33 = vmul.f32 %v448_v30, %v448_v30  ;;  %v492_v7 = vmul.f32 %v1236_v58, %v1236_v58  ;;  %v536_v23 = vsub.f32 %v1180_v8, %v448_v30 }
 0x1d0   : > { %v431_v26 = vpop.xlane.xlu0 %430  ;;  %v437_v27 = vpop.xlane.xlu1 %436 }
 0x1d1   : > { %v1220_v34 = vmul.f32 0.015625, %v437_v27  ;;  %v1222_v37 = vmul.f32 0.015625, %v431_v26 }
 0x1d3   : > { %v489_v40 = vmul.f32 %v1220_v34, %v1220_v34  ;;  %v486_v46 = vmul.f32 %v1222_v37, %v1222_v37  ;;  %v534_v30 = vsub.f32 %v1188_v11, %v1222_v37 }
 0x1d4   : > { %v439_v28 = vpop.xlane.xlu0 %438  ;;  %v445_v29 = vpop.xlane.xlu1 %444 }
 0x1d5   : > { %v1230_v47 = vmul.f32 0.015625, %v439_v28  ;;  %v1240_v60 = vmul.f32 0.015625, %v445_v29 }
 0x1d7   : > { %v490_v59 = vmul.f32 %v1230_v47, %v1230_v47  ;;  %v493_v16 = vmul.f32 %v1240_v60, %v1240_v60 }
 0x1d8   : > { %v467_v31 = vpop.xlane.xlu0 %466  ;;  %v441_v32 = vpop.xlane.xlu1 %440 }
 0x1d9   : > { %v480_v35 = vmul.f32 0.015625, %v467_v31  ;;  %v1234_v54 = vmul.f32 0.015625, %v441_v32 }
 0x1db   : > { %v496_v36 = vsub.f32 %v480_v35, %v488_v33  ;;  %v491_v2 = vmul.f32 %v1234_v54, %v1234_v54  ;;  %v537_v35 = vsub.f32 %v1190_v12, %v1220_v34  ;;  %v539_v11 = vsub.f32 %v1196_v15, %v1234_v54 }
 0x1dc   : > { %v469_v38 = vpop.xlane.xlu1 %468  ;;  %v433_v39 = vpop.xlane.xlu0 %432 }
 0x1dd   : > { %v504_v41 = vmax.f32 %v496_v36, 0.0  ;;  %v481_v42 = vmul.f32 0.015625, %v469_v38  ;;  %v1226_v43 = vmul.f32 0.015625, %v433_v39 }
 0x1df   : > { %v512_v44 = vadd.f32 1e-05, %v504_v41  ;;  %v497_v45 = vsub.f32 %v481_v42, %v489_v40  ;;  %v487_v48 = vmul.f32 %v1226_v43, %v1226_v43  ;;  %v535_v34 = vsub.f32 %v1194_v14, %v1226_v43 }
 0x1e0   : > { %v463_v49 = vpop.xlane.xlu0 %462  ;;  %v465_v50 = vpop.xlane.xlu1 %464 }
 0x1e1   : > { %822 = vrsqrt.f32 %v512_v44  ;;  %v505_v51 = vmax.f32 %v497_v45, 0.0  ;;  %v478_v52 = vmul.f32 0.015625, %v463_v49  ;;  %v479_v53 = vmul.f32 0.015625, %v465_v50 }
 0x1e3   : > { %v513_v55 = vadd.f32 1e-05, %v505_v51  ;;  %v494_v56 = vsub.f32 %v478_v52, %v486_v46  ;;  %v495_v57 = vsub.f32 %v479_v53, %v487_v48  ;;  %v538_v46 = vsub.f32 %v1185_v10, %v1230_v47 }
 0x1e4   : > { %v471_v61 = vpop.xlane.xlu0 %470  ;;  %v473_v62 = vpop.xlane.xlu1 %472  ;;  %v540_v51 = vsub.f32 %v1182_v9, %v1236_v58  ;;  %v541_v47 = vsub.f32 %v1192_v13, %v1240_v60 }
 0x1e5   : > { %824 = vrsqrt.f32 %v513_v55  ;;  %v502_v63 = vmax.f32 %v494_v56, 0.0  ;;  %v503_v0 = vmax.f32 %v495_v57, 0.0  ;;  %v482_v1 = vmul.f32 0.015625, %v471_v61 }
 0x1e6   : > { %v483_v3 = vmul.f32 0.015625, %v473_v62 }
 0x1e7   : > { %v510_v4 = vadd.f32 1e-05, %v502_v63  ;;  %v511_v5 = vadd.f32 1e-05, %v503_v0  ;;  %v498_v6 = vsub.f32 %v482_v1, %v490_v59 }
 0x1e8   : > { %v499_v17 = vsub.f32 %v483_v3, %v491_v2  ;;  %v475_v18 = vpop.xlane.xlu0 %474  ;;  %v477_v19 = vpop.xlane.xlu1 %476 }
 0x1e9   : > { %826 = vrsqrt.f32 %v510_v4  ;;  %v506_v20 = vmax.f32 %v498_v6, 0.0  ;;  %v484_v21 = vmul.f32 0.015625, %v475_v18  ;;  %v485_v22 = vmul.f32 0.015625, %v477_v19 }
 0x1ea   : > { %828 = vrsqrt.f32 %v511_v5  ;;  %v507_v24 = vmax.f32 %v499_v17, 0.0 }
 0x1eb   : > { %v823_v25 = vpop.eup %822  ;;  %v514_v26 = vadd.f32 1e-05, %v506_v20  ;;  %v500_v27 = vsub.f32 %v484_v21, %v492_v7  ;;  %v501_v28 = vsub.f32 %v485_v22, %v493_v16 }
 0x1ec   : > { %v544_v29 = vmul.f32 %v823_v25, %v536_v23  ;;  %v515_v31 = vadd.f32 1e-05, %v507_v24 }
 0x1ed   : > { %830 = vrsqrt.f32 %v514_v26  ;;  %v508_v32 = vmax.f32 %v500_v27, 0.0  ;;  %v509_v33 = vmax.f32 %v501_v28, 0.0 }
 0x1ee   : > { %v552_v36 = vmax.f32 %v544_v29, 0.0  ;;  %832 = vrsqrt.f32 %v515_v31 }
 0x1ef   : > { %v825_v38 = vpop.eup %824  ;;  %v516_v39 = vadd.f32 1e-05, %v508_v32  ;;  %v517_v40 = vadd.f32 1e-05, %v509_v33 }
 0x1f0   : > { %560 = vst [vmem:[%s1252_s19 + $0x10] sm:$0xff] %v552_v36  ;;  %v545_v8 = vmul.f32 %v825_v38, %v537_v35 }
 0x1f1   : > { %834 = vrsqrt.f32 %v516_v39 }
 0x1f2   : > { %v553_v41 = vmax.f32 %v545_v8, 0.0  ;;  %836 = vrsqrt.f32 %v517_v40 }
 0x1f3   : > { %v827_v12 = vpop.eup %826 }
 0x1f4   : > { %v829_v42 = vpop.eup %828  ;;  %561 = vst [vmem:[%s1252_s19 + $0x18] sm:$0xff] %v553_v41  ;;  %v542_v44 = vmul.f32 %v827_v12, %v534_v30 }
 0x1f5   : > { %v543_v45 = vmul.f32 %v829_v42, %v535_v34 }
 0x1f6   : > { %v550_v48 = vmax.f32 %v542_v44, 0.0 }
 0x1f7   : > { %v831_v49 = vpop.eup %830  ;;  %v551_v37 = vmax.f32 %v543_v45, 0.0 }
 0x1f8   : > { %v833_v50 = vpop.eup %832  ;;  %558 = vst [vmem:[%s1252_s19] sm:$0xff] %v550_v48  ;;  %v546_v14 = vmul.f32 %v831_v49, %v538_v46 }
 0x1f9   : > { %559 = vst [vmem:[%s1252_s19 + $0x8] sm:$0xff] %v551_v37  ;;  %v547_v43 = vmul.f32 %v833_v50, %v539_v11 }
 0x1fa   : > { %v554_v52 = vmax.f32 %v546_v14, 0.0 }
 0x1fb   : > { %v835_v10 = vpop.eup %834  ;;  %v555_v53 = vmax.f32 %v547_v43, 0.0 }
 0x1fc   : > { %v837_v15 = vpop.eup %836  ;;  %562 = vst [vmem:[%s1252_s19 + $0x20] sm:$0xff] %v554_v52  ;;  %v548_v54 = vmul.f32 %v835_v10, %v540_v51 }
 0x1fd   : > { %563 = vst [vmem:[%s1252_s19 + $0x28] sm:$0xff] %v555_v53  ;;  %v549_v55 = vmul.f32 %v837_v15, %v541_v47 }
 0x1fe   : > { %v556_v56 = vmax.f32 %v548_v54, 0.0 }
 0x1ff   : > { %v557_v9 = vmax.f32 %v549_v55, 0.0 }
 0x200   : > { %564 = vst [vmem:[%s1252_s19 + $0x30] sm:$0xff] %v556_v56 }
 0x201   : > { %565 = vst [vmem:[%s1252_s19 + $0x38] sm:$0xff] %v557_v9 }
 0x202   : > { %909 = shalt.err (!%p906_p5)
}
 0x203   : > { %s910_s3 = scalar_lea.hbm %s1277_s5, 1024  ;;  %s914_s27 = scalar_lea.hbm %s1332_s2, 2048 }
 0x204   : > { %p911_p9 = scmp.ne.s32.totalorder %s1277_s5, %s910_s3  ;;  %p915_p3 = scmp.lt.u32.totalorder %s1277_s5, %s1332_s2 }
 0x205   : > { %p916_p7 = scmp.lt.u32.totalorder %s914_s27, %s910_s3  ;;  %p918_p13 = scmp.lt.u32.totalorder %s910_s3, %s1277_s5 }
 0x206   : > { %p912_p1 = pnand %p911_p9, %p1105_p10 }
 0x207   : > { %p917_p4 = por %p916_p7, %p915_p3 }
 0x208   : > { %p913_p2 = pneg %p912_p1 }
 0x209   : > { %p919_p6 = por %p918_p13, %p917_p4 }
 0x20b   : > { %p920_p8 = pnand %p919_p6, %p913_p2 }
 0x20d   : > { %923 = shalt.err (!%p920_p8)
}
 0x20e   : > { %s989_s17 = smov 128   ;;  %s990_s19 = smov 8  }
 0x20f   : > { %743 = dma.vmem_to_hbm [thread:$0]  (%p1105_p10), %s1279_s6, 1024, %s1277_s5, %s567_s12, %s989_s17, %s989_s17, %s990_s19  }
 0x210 PF: > { %s595_s21 = sand.u32 1, %s962_s9   ;;  %p1350_p12 = scmp.ne.s32.totalorder %s1340_s20, 0 }
 0x211   : > { %p1351_p11 = scmp.ge.s32.totalorder %s982_s14, 2  ;;  %s596_s7 = scalar_lea.sflag [#allocation6], %s595_s21 }
 0x213   : > { %p754_p0 = pnand %p1351_p11, %p1350_p12 }
 0x215   : > { %957 = dma.done.wait (!%p754_p0), %s596_s7, 1024  }
 0x216   : > { %959 = vsyncadd (!%p754_p0), %s596_s7, 4294966272  ;;  %s19_s14 = sadd.s32 1, %s982_s14   ;;  %s1352_s9 = smov %s966_s10 }
 0x217   : > { %p16_p5 = scmp.ge.s32.totalorder %s19_s14, 4   ;;  %s1353_s10 = smov %s970_s11 }
 0x218   : > { %s1354_s11 = smov %s1114_s28  ;;  %s1355_s12 = smov %s978_s13 }
 0x219   : > { %s1356_s13 = smov %s1358_s25  ;;  %18 = sbr.rel (!%p16_p5) target bundleno = 7 (0x7), region = 86 }
 0x220   :  { %601 = vsyncpa [#allocation5], 1 }
 0x221   :  { %603 = vsyncpa [#allocation5 + $0x1], 1 }
 0x222   :  { %604 = vsyncpa [#allocation8], 1 }
 0x223   :  { %605 = vsyncpa [#allocation6], 1 }
 0x224   :  { %607 = vsyncpa [#allocation6 + $0x1], 1 }

</bundles_post_ra>
